<compile_context>
chip_gen: v5e
topology: v5e:2x2
jax: 0.10.0
libtpu: 0.0.40
codegen_flags: <defaults>
</compile_context>

<pallas_src>
import numpy as np
import jax
import jax.numpy as jnp
from jax.experimental import pallas as pl
from jax.experimental.pallas import tpu as pltpu


def _nearest_select_matrix(src_hw, dst_hw, dtype):
    """Binary S (Hs*Ws, Ht*Wt) such that X.reshape(-1, Hs*Ws) @ S == nearest-resize(X) flattened.

    PyTorch 'nearest': src = floor(dst * src_size / dst_size).
    S[hs*Ws+ws, ht*Wt+wt] = [hs == (ht*Hs)//Ht] * [ws == (wt*Ws)//Wt] = kron(R^T, C).
    # NOTE: S grows as (Hs*Ws)x(Ht*Wt); fine for YOLO-scale fuse levels at these test shapes.
    """
    Hs, Ws = src_hw
    Ht, Wt = dst_hw
    src_h = (np.arange(Ht) * Hs) // Ht
    src_w = (np.arange(Wt) * Ws) // Wt
    R = (src_h[:, None] == np.arange(Hs)[None, :]).astype(np.float32)   # (Ht, Hs)
    C = (np.arange(Ws)[:, None] == src_w[None, :]).astype(np.float32)   # (Ws, Wt)
    S = np.kron(R.T, C)                                                 # (Hs*Ws, Ht*Wt)
    return jnp.asarray(S, dtype=dtype)


def _make_cbfuse_kernel(n_src):
    def kernel(*refs):
        # refs = [x0, S0, x1, S1, ..., last, out, acc_scratch]
        acc_ref = refs[-1]
        out_ref = refs[-2]
        last_ref = refs[-3]
        # Init accumulator with the target-resolution branch (f32 accumulation).
        acc_ref[...] = last_ref[...].astype(jnp.float32)
        for i in range(n_src):
            x = refs[2 * i][...]          # (TB, Hs_i*Ws_i)
            s = refs[2 * i + 1][...]      # (Hs_i*Ws_i, Ht*Wt) binary selection matrix
            acc_ref[...] += jnp.dot(x, s, preferred_element_type=jnp.float32)
        out_ref[...] = acc_ref[...].astype(out_ref.dtype)
    return kernel


def _choose_channel_block(nc, per_chan_bytes, fixed_bytes, vmem_budget):
    """Largest channel block TB dividing nc, fitting the VMEM budget, layout-legal."""
    cap = max(1, int((vmem_budget - fixed_bytes) // max(per_chan_bytes, 1)))
    if nc >= 16:                       # leave >=2 grid steps for the 2 TCs on v7x
        cap = min(cap, nc // 2)
    divisors = [d for d in range(1, nc + 1) if nc % d == 0]
    # block's second-to-last dim must be a multiple of 8 or the full extent
    valid = [d for d in divisors if (d % 8 == 0) or (d == nc)]
    under_cap = [d for d in valid if d <= cap]
    if under_cap:
        return max(under_cap)
    return min(valid)                  # fallback: smallest legal block


def cbfuse(xs, idx, *, vmem_budget_bytes=24 << 20):
    """xs: [list_of_NCHW_arrays, ..., last_NCHW_array]; idx: selection per early branch."""
    last = xs[-1]
    N, C, Ht, Wt = last.shape
    NC = N * C
    HWt = Ht * Wt
    selected = [x[idx[i]] for i, x in enumerate(xs[:-1])]
    n_src = len(selected)
    out_dtype = last.dtype
    # Binary selection matrices are exact in 16-bit floats; keep them in the
    # activation dtype for bf16/fp16 nets (halves DMA + uses fast MXU path).
    mat_dtype = last.dtype if np.dtype(last.dtype).itemsize == 2 else jnp.float32

    # ---- layout plumbing (outside the kernel): lane-dense 2-D views ----
    last_f = last.reshape(NC, HWt)
    srcs_f, mats, src_hw = [], [], []
    for s in selected:
        Hs, Ws = s.shape[2], s.shape[3]
        src_hw.append((Hs, Ws))
        srcs_f.append(s.reshape(NC, Hs * Ws))
        mats.append(_nearest_select_matrix((Hs, Ws), (Ht, Wt), mat_dtype))

    # ---- channel block size from a VMEM budget ----
    bpe = np.dtype(last.dtype).itemsize
    per_chan = 2 * bpe * (sum(h * w for h, w in src_hw) + 2 * HWt) + 4 * HWt      # dbl-buffered x/last/out + f32 scratch
    fixed = 2 * np.dtype(mat_dtype).itemsize * sum(h * w * HWt for h, w in src_hw)  # selection matrices
    TB = _choose_channel_block(NC, per_chan, fixed, vmem_budget_bytes)

    args, in_specs = [], []
    for s_f, m, (Hs, Ws) in zip(srcs_f, mats, src_hw):
        args += [s_f, m]
        in_specs += [
            pl.BlockSpec((TB, Hs * Ws), lambda b: (b, 0)),      # TB channels of this branch
            pl.BlockSpec((Hs * Ws, HWt), lambda b: (0, 0)),     # constant selection matrix
        ]
    args.append(last_f)
    in_specs.append(pl.BlockSpec((TB, HWt), lambda b: (b, 0)))

    out = pl.pallas_call(
        _make_cbfuse_kernel(n_src),
        out_shape=jax.ShapeDtypeStruct((NC, HWt), out_dtype),
        grid=(NC // TB,),
        in_specs=in_specs,
        out_specs=pl.BlockSpec((TB, HWt), lambda b: (b, 0)),
        scratch_shapes=[pltpu.VMEM((TB, HWt), jnp.float32)],
        compiler_params=pltpu.CompilerParams(
            dimension_semantics=("parallel",),
            vmem_limit_bytes=max(int(vmem_budget_bytes), 32 << 20),
        ),
    )(*args)

    return out.reshape(N, C, Ht, Wt)


# ---------------- pure-JAX reference (for verification) ----------------
def _nearest_ref(x, Ht, Wt):
    Hs, Ws = x.shape[2], x.shape[3]
    hi = (np.arange(Ht) * Hs) // Ht
    wi = (np.arange(Wt) * Ws) // Wt
    return x[:, :, hi, :][:, :, :, wi]


def cbfuse_ref(xs, idx):
    last = xs[-1]
    Ht, Wt = last.shape[2], last.shape[3]
    acc = last
    for i, xs_i in enumerate(xs[:-1]):
        acc = acc + _nearest_ref(xs_i[idx[i]], Ht, Wt)
    return acc


if __name__ == "__main__":
    key = jax.random.PRNGKey(0)
    k = jax.random.split(key, 6)

    N, Cch = 2, 4
    # CBFuse(idx=[1, 0]): earlier pyramid levels (each a list of feature maps) + target map.
    idx = [1, 0]
    xs0 = [jax.random.normal(k[0], (N, Cch, 32, 32), jnp.float32),
           jax.random.normal(k[1], (N, Cch, 8, 8), jnp.float32)]    # idx[0]=1 -> (8,8)
    xs1 = [jax.random.normal(k[2], (N, Cch, 4, 4), jnp.float32),
           jax.random.normal(k[3], (N, Cch, 2, 2), jnp.float32)]    # idx[1]=0 -> (4,4)
    last = jax.random.normal(k[4], (N, Cch, 16, 16), jnp.float32)   # target size (16,16)
    xs = [xs0, xs1, last]

    out = cbfuse(xs, idx)
    out = jax.block_until_ready(out)

    ref = cbfuse_ref(xs, idx)
    np.testing.assert_allclose(np.asarray(out), np.asarray(ref), rtol=1e-5, atol=1e-5)

    print("KERNEL_OK")
</pallas_src>

<mosaic_0001>
module attributes {stable_mosaic.version = 11 : i64} {
  func.func @kernel(%arg0: i32, %arg1: memref<8x64xf32, #tpu.memory_space<vmem>>, %arg2: memref<64x256xf32, #tpu.memory_space<vmem>>, %arg3: memref<8x16xf32, #tpu.memory_space<vmem>>, %arg4: memref<16x256xf32, #tpu.memory_space<vmem>>, %arg5: memref<8x256xf32, #tpu.memory_space<vmem>>, %arg6: memref<8x256xf32, #tpu.memory_space<vmem>>, %arg7: memref<8x256xf32, #tpu.memory_space<vmem>>) attributes {dimension_semantics = [#tpu.dimension_semantics<parallel>], iteration_bounds = array<i64: 1>, scalar_prefetch = 0 : i64, scratch_operands = 1 : i64, tpu.core_type = #tpu.core_type<tc>, window_params = [{transform_indices = @transform_0, window_bounds = array<i64: 8, 64>}, {pipeline_mode = #tpu.pipeline_mode<synchronous>, transform_indices = @transform_1, window_bounds = array<i64: 64, 256>}, {transform_indices = @transform_2, window_bounds = array<i64: 8, 16>}, {pipeline_mode = #tpu.pipeline_mode<synchronous>, transform_indices = @transform_3, window_bounds = array<i64: 16, 256>}, {transform_indices = @transform_4, window_bounds = array<i64: 8, 256>}, {transform_indices = @transform_5, window_bounds = array<i64: 8, 256>}]} {
    %c0 = arith.constant 0 : index
    %c0_0 = arith.constant 0 : index
    %0 = vector.load %arg5[%c0, %c0_0] : memref<8x256xf32, #tpu.memory_space<vmem>>, vector<8x256xf32>
    %c0_1 = arith.constant 0 : index
    %c0_2 = arith.constant 0 : index
    %1 = vector.load %arg7[%c0_1, %c0_2] : memref<8x256xf32, #tpu.memory_space<vmem>>, vector<8x256xf32>
    tpu.vector_store %arg7[%c0_1, %c0_2], %0 {strides = array<i32>} : memref<8x256xf32, #tpu.memory_space<vmem>>, vector<8x256xf32>,
    %c0_3 = arith.constant 0 : index
    %c0_4 = arith.constant 0 : index
    %2 = vector.load %arg1[%c0_3, %c0_4] : memref<8x64xf32, #tpu.memory_space<vmem>>, vector<8x64xf32>
    %c0_5 = arith.constant 0 : index
    %c0_6 = arith.constant 0 : index
    %3 = vector.load %arg2[%c0_5, %c0_6] : memref<64x256xf32, #tpu.memory_space<vmem>>, vector<64x256xf32>
    %c0_7 = arith.constant 0 : index
    %c0_8 = arith.constant 0 : index
    %4 = vector.load %arg7[%c0_7, %c0_8] : memref<8x256xf32, #tpu.memory_space<vmem>>, vector<8x256xf32>
    %cst = arith.constant dense<0.000000e+00> : vector<8x256xf32>
    %5 = tpu.matmul %2, %3, %cst {dimension_numbers = #tpu.dot_dimension_numbers<[1], [0], [0], [1], [0, 0, 1, 1], [], []>} : vector<8x64xf32>, vector<64x256xf32>, vector<8x256xf32> -> vector<8x256xf32>
    %6 = arith.addf %4, %5 : vector<8x256xf32>
    %c0_9 = arith.constant 0 : index
    %c0_10 = arith.constant 0 : index
    %7 = vector.load %arg7[%c0_9, %c0_10] : memref<8x256xf32, #tpu.memory_space<vmem>>, vector<8x256xf32>
    tpu.vector_store %arg7[%c0_9, %c0_10], %6 {strides = array<i32>} : memref<8x256xf32, #tpu.memory_space<vmem>>, vector<8x256xf32>,
    %c0_11 = arith.constant 0 : index
    %c0_12 = arith.constant 0 : index
    %8 = vector.load %arg3[%c0_11, %c0_12] : memref<8x16xf32, #tpu.memory_space<vmem>>, vector<8x16xf32>
    %c0_13 = arith.constant 0 : index
    %c0_14 = arith.constant 0 : index
    %9 = vector.load %arg4[%c0_13, %c0_14] : memref<16x256xf32, #tpu.memory_space<vmem>>, vector<16x256xf32>
    %c0_15 = arith.constant 0 : index
    %c0_16 = arith.constant 0 : index
    %10 = vector.load %arg7[%c0_15, %c0_16] : memref<8x256xf32, #tpu.memory_space<vmem>>, vector<8x256xf32>
    %cst_17 = arith.constant dense<0.000000e+00> : vector<8x256xf32>
    %11 = tpu.matmul %8, %9, %cst_17 {dimension_numbers = #tpu.dot_dimension_numbers<[1], [0], [0], [1], [0, 0, 1, 1], [], []>} : vector<8x16xf32>, vector<16x256xf32>, vector<8x256xf32> -> vector<8x256xf32>
    %12 = arith.addf %10, %11 : vector<8x256xf32>
    %c0_18 = arith.constant 0 : index
    %c0_19 = arith.constant 0 : index
    %13 = vector.load %arg7[%c0_18, %c0_19] : memref<8x256xf32, #tpu.memory_space<vmem>>, vector<8x256xf32>
    tpu.vector_store %arg7[%c0_18, %c0_19], %12 {strides = array<i32>} : memref<8x256xf32, #tpu.memory_space<vmem>>, vector<8x256xf32>,
    %c0_20 = arith.constant 0 : index
    %c0_21 = arith.constant 0 : index
    %14 = vector.load %arg7[%c0_20, %c0_21] : memref<8x256xf32, #tpu.memory_space<vmem>>, vector<8x256xf32>
    %c0_22 = arith.constant 0 : index
    %c0_23 = arith.constant 0 : index
    %15 = vector.load %arg6[%c0_22, %c0_23] : memref<8x256xf32, #tpu.memory_space<vmem>>, vector<8x256xf32>
    tpu.vector_store %arg6[%c0_22, %c0_23], %14 {strides = array<i32>} : memref<8x256xf32, #tpu.memory_space<vmem>>, vector<8x256xf32>,
    return
  }
  func.func @transform_0(%arg0: i32) -> (i32, i32) {
    %c0_i32 = arith.constant 0 : i32
    %c0_i32_0 = arith.constant 0 : i32
    return %arg0, %c0_i32 : i32, i32
  }
  func.func @transform_1(%arg0: i32) -> (i32, i32) {
    %c0_i32 = arith.constant 0 : i32
    %c0_i32_0 = arith.constant 0 : i32
    %c0_i32_1 = arith.constant 0 : i32
    return %c0_i32, %c0_i32_0 : i32, i32
  }
  func.func @transform_2(%arg0: i32) -> (i32, i32) {
    %c0_i32 = arith.constant 0 : i32
    %c0_i32_0 = arith.constant 0 : i32
    return %arg0, %c0_i32 : i32, i32
  }
  func.func @transform_3(%arg0: i32) -> (i32, i32) {
    %c0_i32 = arith.constant 0 : i32
    %c0_i32_0 = arith.constant 0 : i32
    %c0_i32_1 = arith.constant 0 : i32
    return %c0_i32, %c0_i32_0 : i32, i32
  }
  func.func @transform_4(%arg0: i32) -> (i32, i32) {
    %c0_i32 = arith.constant 0 : i32
    %c0_i32_0 = arith.constant 0 : i32
    return %arg0, %c0_i32 : i32, i32
  }
  func.func @transform_5(%arg0: i32) -> (i32, i32) {
    %c0_i32 = arith.constant 0 : i32
    %c0_i32_0 = arith.constant 0 : i32
    return %arg0, %c0_i32 : i32, i32
  }
}

</mosaic_0001>

<bundles_post_ra>
// kernel: tpu_custom_call.1
= control target key start
LH: loop header
LB: loop body
LE: loop exit
PB: predicated region body
PF: predicated region fallthrough
CT: control target
= control target key end

     0   :  { %10 = vsyncpa [#allocation4], 0  ;;  %s462_s0 = inlined_call_operand.hbm [shape: f32[8,64], index: 0, kind: input, shape index: {}]   ;;  %s463_s1 = inlined_call_operand.hbm [shape: f32[64,256], index: 1, kind: input, shape index: {}]   ;;  %s464_s2 = inlined_call_operand.hbm [shape: f32[8,16], index: 2, kind: input, shape index: {}]   ;;  %s465_s3 = inlined_call_operand.hbm [shape: f32[16,256], index: 3, kind: input, shape index: {}]   ;;  %s466_s4 = inlined_call_operand.hbm [shape: f32[8,256], index: 4, kind: input, shape index: {}]   ;;  %s467_s5 = inlined_call_operand.hbm [shape: f32[8,256], index: 5, kind: output, shape index: {}]  }
   0x1   :  { %11 = vsyncpa [#allocation7], 0 }
   0x2   :  { %12 = vsyncpa [#allocation10], 0  ;;  %s29_s20 = sshll.u32 %s463_s1, 4  ;;  %s30_s20 = int_to_ptr.hbm [resolvable:$true] %s29_s20 }
   0x3   :  { %13 = vsyncpa [#allocation5], 0  ;;  %s406_s21 = smov [#allocation6]   ;;  %s53_s25 = sshll.u32 %s465_s3, 4  ;;  %s54_s25 = int_to_ptr.hbm [resolvable:$true] %s53_s25 }
   0x4   :  { %s31_s22 = sshll.u32 %s406_s21, 4  ;;  %s407_s26 = smov 256   ;;  %s32_s22 = int_to_ptr.vmem [resolvable:$true] %s31_s22 }
   0x5   :  { %s408_s27 = smov 16   ;;  %s409_s28 = smov [#allocation9]  }
   0x6   :  { %37 = dma.hbm_to_vmem [thread:$0]  %s30_s20, 2048, %s32_s22, [#allocation7], %s407_s26, %s407_s26, %s408_s27  }
   0x7   :  { %s55_s29 = sshll.u32 %s409_s28, 4  ;;  %s19_s7 = sshll.u32 %s462_s0, 4  ;;  %s56_s29 = int_to_ptr.vmem [resolvable:$true] %s55_s29  ;;  %s20_s7 = int_to_ptr.hbm [resolvable:$true] %s19_s7 }
   0x8   :  { %61 = dma.hbm_to_vmem [thread:$0]  %s54_s25, 512, %s56_s29, [#allocation10], %s407_s26, %s407_s26, %s408_s27  }
   0x9   :  { %s43_s9 = sshll.u32 %s464_s2, 4  ;;  %s410_s10 = smov [#allocation3]   ;;  %s44_s9 = int_to_ptr.hbm [resolvable:$true] %s43_s9 }
   0xa   :  { %s21_s11 = sshll.u32 %s410_s10, 4  ;;  %s411_s3 = smov [#allocation8]   ;;  %s22_s11 = int_to_ptr.vmem [resolvable:$true] %s21_s11 }
   0xb   :  { %24 = dma.hbm_to_vmem [thread:$0]  %s20_s7, 128, %s22_s11, [#allocation4]  }
   0xc   :  { %s45_s12 = sshll.u32 %s411_s3, 4  ;;  %s67_s15 = sshll.u32 %s466_s4, 4  ;;  %s46_s12 = int_to_ptr.vmem [resolvable:$true] %s45_s12  ;;  %s68_s15 = int_to_ptr.hbm [resolvable:$true] %s67_s15 }
   0xd   :  { %48 = dma.hbm_to_vmem [thread:$0]  %s44_s9, 128, %s46_s12, [#allocation7]  }
   0xe   :  { %s412_s0 = smov [#allocation11]  }
   0xf   :  { %s69_s16 = sshll.u32 %s412_s0, 4  ;;  %s70_s16 = int_to_ptr.vmem [resolvable:$true] %s69_s16 }
  0x10   :  { %72 = dma.hbm_to_vmem [thread:$0]  %s68_s15, 256, %s70_s16, [#allocation10]  }
  0x11   :  { %398 = dma.done.wait [#allocation4], 128  }
  0x12   :  { %399 = vsyncadd [#allocation4], 4294967168 }
  0x13   :  { %400 = dma.done.wait [#allocation7], 2176  }
  0x14   :  { %401 = vsyncadd [#allocation7], 4294965120 }
  0x15   :  { %402 = dma.done.wait [#allocation10], 768  }
  0x16   :  { %403 = vsyncadd [#allocation10], 4294966528  ;;  %v112_v0 = vld [vmem:[#allocation6 + $0x70] sm:$0xff]  ;;  %v113_v1 = vld [vmem:[#allocation6 + $0x78] sm:$0xff]  ;;  %vm171_vm0 = vcmask 130048   ;;  %vm116_vm1 = vcmask 523264  }
  0x17   :  { %v110_v2 = vld [vmem:[#allocation6 + $0x60] sm:$0xff]  ;;  %128 = vmatpush.msra.mxu0 %v112_v0  ;;  %148 = vmatpush.msra.mxu1 %v113_v1  ;;  %v111_v3 = vld [vmem:[#allocation6 + $0x68] sm:$0xff]  ;;  %v108_v4 = vld [vmem:[#allocation6 + $0x50] sm:$0xff]  ;;  %s413_s2 = smov [#allocation12]   ;;  %s230_s19 = sshll.u32 %s467_s5, 4  ;;  %s231_s19 = int_to_ptr.hbm [resolvable:$true] %s230_s19 }
  0x18   :  { %v109_v5 = vld [vmem:[#allocation6 + $0x58] sm:$0xff]  ;;  %v168_v7 = vld [vmem:[#allocation9 + $0x18] sm:$0xff]  ;;  %v107_v9 = vld [vmem:[#allocation6 + $0x48] sm:$0xff]  ;;  %s228_s4 = sshll.u32 %s413_s2, 4  ;;  %s229_s4 = int_to_ptr.vmem [resolvable:$true] %s228_s4 }
  0x19   :  { %129 = vmatpush.msra.mxu0 %v110_v2  ;;  %149 = vmatpush.msra.mxu1 %v111_v3  ;;  %v167_v6 = vld [vmem:[#allocation9 + $0x10] sm:$0xff]  ;;  %v106_v8 = vld [vmem:[#allocation6 + $0x40] sm:$0xff]  ;;  %v165_v10 = vld [vmem:[#allocation9] sm:$0xff] }
  0x1a   :  { %189 = vmatpush.msra.mxu2 %v167_v6  ;;  %209 = vmatpush.msra.mxu3 %v168_v7  ;;  %v166_v11 = vld [vmem:[#allocation9 + $0x8] sm:$0xff]  ;;  %v164_v12 = vld [vmem:[#allocation8] sm:$0xff]  ;;  %v105_v14 = vld [vmem:[#allocation6 + $0x38] sm:$0xff] }
  0x1b   :  { %130 = vmatpush.msra.mxu0 %v108_v4  ;;  %150 = vmatpush.msra.mxu1 %v109_v5  ;;  %v104_v13 = vld [vmem:[#allocation6 + $0x30] sm:$0xff]  ;;  %v102_v15 = vld [vmem:[#allocation6 + $0x20] sm:$0xff]  ;;  %v103_v16 = vld [vmem:[#allocation6 + $0x28] sm:$0xff] }
  0x1c   :  { %190 = vmatpush.msra.mxu2 %v165_v10  ;;  %210 = vmatpush.msra.mxu3 %v166_v11  ;;  %v100_v17 = vld [vmem:[#allocation6 + $0x10] sm:$0xff]  ;;  %v101_v18 = vld [vmem:[#allocation6 + $0x18] sm:$0xff]  ;;  %v98_v19 = vld [vmem:[#allocation6] sm:$0xff] }
  0x1d   :  { %131 = vmatpush.msra.mxu0 %v106_v8  ;;  %151 = vmatpush.msra.mxu1 %v107_v9  ;;  %v99_v20 = vld [vmem:[#allocation6 + $0x8] sm:$0xff]  ;;  %v97_v21 = vld [vmem:[#allocation3] sm:$0xff]  ;;  %v94_v23 = vld [vmem:[#allocation11 + $0x8] sm:$0xff] }
  0x1e   :  { %244 = vmatmul.msk.f32.vlgmr.msra.gmra.mxu2 %vm171_vm0, %v164_v12  ;;  %245 = vmatmul.msk.f32.vlgmr.msra.gmra.mxu3 %vm171_vm0, %v164_v12  ;;  %v93_v22 = vld [vmem:[#allocation11] sm:$0xff] }
  0x1f   :  { %132 = vmatpush.msra.mxu0 %v104_v13  ;;  %152 = vmatpush.msra.mxu1 %v105_v14 }
  0x21   :  { %133 = vmatpush.msra.mxu0 %v102_v15  ;;  %153 = vmatpush.msra.mxu1 %v103_v16 }
  0x23   :  { %134 = vmatpush.msra.mxu0 %v100_v17  ;;  %154 = vmatpush.msra.mxu1 %v101_v18 }
  0x25   :  { %135 = vmatpush.msra.mxu0 %v98_v19  ;;  %155 = vmatpush.msra.mxu1 %v99_v20 }
  0x26   :  { %242 = vmatmul.msk.f32.vlgmr.msra.gmra.mxu0 %vm116_vm1, %v97_v21  ;;  %243 = vmatmul.msk.f32.vlgmr.msra.gmra.mxu1 %vm116_vm1, %v97_v21 }
  0xa1   :  { %v192_v24 = vpop.f32.mrf.mxu2  ;;  %v212_v25 = vpop.f32.mrf.mxu3 }
  0xa3   :  { %v137_v26 = vpop.f32.mrf.mxu0  ;;  %v157_v27 = vpop.f32.mrf.mxu1 }
  0xa4   :  { %v160_v28 = vadd.f32 %v137_v26, %v93_v22  ;;  %v161_v29 = vadd.f32 %v157_v27, %v94_v23 }
  0xa6   :  { %v215_v30 = vadd.f32 %v192_v24, %v160_v28  ;;  %v216_v31 = vadd.f32 %v212_v25, %v161_v29 }
  0xa8   :  { %221 = vst [vmem:[#allocation12] sm:$0xff] %v215_v30 }
  0xa9   :  { %222 = vst [vmem:[#allocation12 + $0x8] sm:$0xff] %v216_v31 }
  0xaa   :  { %233 = dma.vmem_to_hbm [thread:$0]  %s229_s4, 256, %s231_s19, [#allocation5]  }
  0xab   :  { %404 = dma.done.wait [#allocation5], 256  }
  0xac   :  { %405 = vsyncadd [#allocation5], 4294967040 }
  0xad   :  { %238 = vsyncpa [#allocation4], 1 }
  0xae   :  { %239 = vsyncpa [#allocation7], 1 }
  0xaf   :  { %240 = vsyncpa [#allocation10], 1 }
  0xb0   :  { %241 = vsyncpa [#allocation5], 1 }

</bundles_post_ra>
